<compile_context>
chip_gen: v6e
topology: v6e:2x2x1
jax: 0.10.0
libtpu: 0.0.40
codegen_flags: <defaults>
</compile_context>

<pallas_src>
import functools
import math

import jax
import jax.numpy as jnp
from jax.experimental import pallas as pl
from jax.experimental.pallas import tpu as pltpu

_LANES = 128


def _focal_kl_partial_kernel(t_ref, s_ref, out_ref, *, inv_T, gamma):
    # Cast after the (possibly bf16) DMA so HBM/VMEM traffic stays narrow.
    t_logit = t_ref[...].astype(jnp.float32)
    s_logit = s_ref[...].astype(jnp.float32)

    # sigmoid(x) = 1 / (1 + exp(-x)).  Padded teacher logits of -1e4 give
    # exp(+1e4) = inf -> sigmoid = exactly 0, so padding contributes nothing.
    t = (1.0 / (1.0 + jnp.exp(-t_logit))) * inv_T
    s = (1.0 / (1.0 + jnp.exp(-s_logit))) * inv_T

    one_minus_s = 1.0 - s
    if gamma == 2.0:                       # default: plain square, no pow
        w = one_minus_s * one_minus_s
    else:
        # 1 - s > 0 because s = sigmoid(.)/T lies in (0, 1/T): pow via exp/log.
        w = jnp.exp(jnp.float32(gamma) * jnp.log(one_minus_s))

    val = w * (t * (t / s))                # same association as the torch code

    # Per-lane partial (sublane reduce only); the lane reduce happens in the
    # epilogue, keeping the output store a lane-dense unmasked 128-wide vst.
    out_ref[...] = jnp.sum(val, axis=0, keepdims=True)


def focal_kl_div(teacher, student, *, T=4.0, gamma=2.0, lambda_=0.5,
                 block_rows=4096):
    """Pallas implementation of FocalKLDiv.forward. Returns a scalar float32."""
    del lambda_  # stored by the torch module but unused in forward()
    assert teacher.shape == student.shape
    N = teacher.shape[0]
    total = math.prod(teacher.shape)

    # Flatten (elementwise + full reduction is layout invariant) and tile
    # lane-dense as (rows, 128).
    n_rows = pl.cdiv(total, _LANES)
    br = min(block_rows, ((n_rows + 7) // 8) * 8)        # multiple of 8
    padded_rows = pl.cdiv(n_rows, br) * br
    padded_total = padded_rows * _LANES

    t_flat = teacher.reshape(-1)
    s_flat = student.reshape(-1)
    if padded_total != total:
        pad = padded_total - total
        t_flat = jnp.pad(t_flat, (0, pad), constant_values=-1e4)  # sigmoid -> 0
        s_flat = jnp.pad(s_flat, (0, pad), constant_values=0.0)   # sigmoid -> 0.5
    t2d = t_flat.reshape(padded_rows, _LANES)
    s2d = s_flat.reshape(padded_rows, _LANES)

    n_blocks = padded_rows // br
    kernel = functools.partial(_focal_kl_partial_kernel,
                               inv_T=float(1.0 / T), gamma=float(gamma))

    partials = pl.pallas_call(
        kernel,
        grid_spec=pltpu.PrefetchScalarGridSpec(
            num_scalar_prefetch=0,
            grid=(n_blocks,),
            in_specs=[
                pl.BlockSpec((br, _LANES), lambda i: (i, 0)),
                pl.BlockSpec((br, _LANES), lambda i: (i, 0)),
            ],
            out_specs=pl.BlockSpec((1, _LANES), lambda i: (0, i)),
        ),
        out_shape=jax.ShapeDtypeStruct((1, n_blocks * _LANES), jnp.float32),
        compiler_params=pltpu.CompilerParams(
            dimension_semantics=("parallel",)),   # independent partials per step
    )(t2d, s2d)

    # Epilogue: finish the reduction, batch mean, and the 0.1*T**2 scale.
    return (jnp.sum(partials) / jnp.float32(N)) * jnp.float32(0.1 * T * T)


if __name__ == "__main__":
    key = jax.random.PRNGKey(0)
    N, C, H, W = 2, 4, 16, 16
    k1, k2 = jax.random.split(key, 2)
    teacher = jax.random.normal(k1, (N, C, H, W), jnp.float32)
    student = jax.random.normal(k2, (N, C, H, W), jnp.float32)

    T, gamma = 4.0, 2.0
    loss = focal_kl_div(teacher, student, T=T, gamma=gamma)
    jax.block_until_ready(loss)

    # Pure-JAX reference mirroring the torch forward exactly.
    t = jax.nn.sigmoid(jnp.transpose(teacher, (0, 2, 3, 1)).reshape(N, -1, C)) / T
    s = jax.nn.sigmoid(jnp.transpose(student, (0, 2, 3, 1)).reshape(N, -1, C)) / T
    ref = (((1.0 - s) ** gamma) * (t * (t / s))).sum(axis=2).sum(axis=1).mean()
    ref = ref * (0.1 * T ** 2)

    assert loss.shape == ()
    assert jnp.allclose(loss, ref, rtol=1e-4, atol=1e-6), (loss, ref)

    print("KERNEL_OK")
</pallas_src>

<mosaic_0001>
module attributes {stable_mosaic.version = 11 : i64} {
  func.func @_focal_kl_partial_kernel(%arg0: i32, %arg1: memref<16x128xf32, #tpu.memory_space<vmem>>, %arg2: memref<16x128xf32, #tpu.memory_space<vmem>>, %arg3: memref<1x128xf32, #tpu.memory_space<vmem>>) attributes {dimension_semantics = [#tpu.dimension_semantics<parallel>], iteration_bounds = array<i64: 1>, scalar_prefetch = 0 : i64, scratch_operands = 0 : i64, tpu.core_type = #tpu.core_type<tc>, window_params = [{transform_indices = @transform_0, window_bounds = array<i64: 16, 128>}, {transform_indices = @transform_1, window_bounds = array<i64: 16, 128>}, {transform_indices = @transform_2, window_bounds = array<i64: 1, 128>}]} {
    %c0 = arith.constant 0 : index
    %c0_0 = arith.constant 0 : index
    %0 = vector.load %arg1[%c0, %c0_0] : memref<16x128xf32, #tpu.memory_space<vmem>>, vector<16x128xf32>
    %c0_1 = arith.constant 0 : index
    %c0_2 = arith.constant 0 : index
    %1 = vector.load %arg2[%c0_1, %c0_2] : memref<16x128xf32, #tpu.memory_space<vmem>>, vector<16x128xf32>
    %cst = arith.constant 0.000000e+00 : f32
    %2 = vector.broadcast %cst : f32 to vector<16x128xf32>
    %3 = arith.subf %2, %0 : vector<16x128xf32>
    %4 = math.exp %3 : vector<16x128xf32>
    %cst_3 = arith.constant 1.000000e+00 : f32
    %5 = vector.broadcast %cst_3 : f32 to vector<16x128xf32>
    %6 = arith.addf %5, %4 : vector<16x128xf32>
    %cst_4 = arith.constant 1.000000e+00 : f32
    %7 = vector.broadcast %cst_4 : f32 to vector<16x128xf32>
    %8 = arith.divf %7, %6 : vector<16x128xf32>
    %cst_5 = arith.constant 2.500000e-01 : f32
    %9 = vector.broadcast %cst_5 : f32 to vector<16x128xf32>
    %10 = arith.mulf %8, %9 : vector<16x128xf32>
    %cst_6 = arith.constant 0.000000e+00 : f32
    %11 = vector.broadcast %cst_6 : f32 to vector<16x128xf32>
    %12 = arith.subf %11, %1 : vector<16x128xf32>
    %13 = math.exp %12 : vector<16x128xf32>
    %cst_7 = arith.constant 1.000000e+00 : f32
    %14 = vector.broadcast %cst_7 : f32 to vector<16x128xf32>
    %15 = arith.addf %14, %13 : vector<16x128xf32>
    %cst_8 = arith.constant 1.000000e+00 : f32
    %16 = vector.broadcast %cst_8 : f32 to vector<16x128xf32>
    %17 = arith.divf %16, %15 : vector<16x128xf32>
    %cst_9 = arith.constant 2.500000e-01 : f32
    %18 = vector.broadcast %cst_9 : f32 to vector<16x128xf32>
    %19 = arith.mulf %17, %18 : vector<16x128xf32>
    %cst_10 = arith.constant 1.000000e+00 : f32
    %20 = vector.broadcast %cst_10 : f32 to vector<16x128xf32>
    %21 = arith.subf %20, %19 : vector<16x128xf32>
    %22 = arith.mulf %21, %21 : vector<16x128xf32>
    %23 = arith.divf %10, %19 : vector<16x128xf32>
    %24 = arith.mulf %10, %23 : vector<16x128xf32>
    %25 = arith.mulf %22, %24 : vector<16x128xf32>
    %cst_11 = arith.constant dense<0.000000e+00> : vector<128xf32>
    %26 = vector.multi_reduction <add>, %25, %cst_11 [0] : vector<16x128xf32> to vector<128xf32>
    %27 = vector.shape_cast %26 : vector<128xf32> to vector<1x128xf32>
    %c0_12 = arith.constant 0 : index
    %c0_13 = arith.constant 0 : index
    %28 = vector.load %arg3[%c0_12, %c0_13] : memref<1x128xf32, #tpu.memory_space<vmem>>, vector<1x128xf32>
    tpu.vector_store %arg3[%c0_12, %c0_13], %27 {strides = array<i32>} : memref<1x128xf32, #tpu.memory_space<vmem>>, vector<1x128xf32>,
    return
  }
  func.func @transform_0(%arg0: i32) -> (i32, i32) {
    %c0_i32 = arith.constant 0 : i32
    %c0_i32_0 = arith.constant 0 : i32
    return %arg0, %c0_i32 : i32, i32
  }
  func.func @transform_1(%arg0: i32) -> (i32, i32) {
    %c0_i32 = arith.constant 0 : i32
    %c0_i32_0 = arith.constant 0 : i32
    return %arg0, %c0_i32 : i32, i32
  }
  func.func @transform_2(%arg0: i32) -> (i32, i32) {
    %c0_i32 = arith.constant 0 : i32
    %c0_i32_0 = arith.constant 0 : i32
    return %c0_i32, %arg0 : i32, i32
  }
}

</mosaic_0001>

<bundles_post_ra>
// kernel: tpu_custom_call.1
= control target key start
LH: loop header
LB: loop body
LE: loop exit
PB: predicated region body
PF: predicated region fallthrough
CT: control target
= control target key end

     0   :  { %7 = vsyncpa [#allocation3], 0  ;;  %s228_s0 = inlined_call_operand.hbm [shape: f32[16,128], index: 0, kind: input, shape index: {}]   ;;  %s229_s1 = inlined_call_operand.hbm [shape: f32[16,128], index: 1, kind: input, shape index: {}]   ;;  %s230_s2 = inlined_call_operand.hbm [shape: f32[1,128], index: 2, kind: output, shape index: {}]  }
   0x1   :  { %8 = vsyncpa [#allocation6], 0 }
   0x2   :  { %9 = vsyncpa [#allocation4], 0  ;;  %s199_s9 = smov [#allocation2]  }
   0x3   :  { %s15_s10 = sshll.u32 %s199_s9, 4  ;;  %s16_s10 = int_to_ptr.vmem [resolvable:$true] %s15_s10 }
   0x4   :  { %s141_s11 = scalar_lea.vmem %s16_s10, 256  ;;  %p146_p1 = scmp.lt.s32.totalorder %s16_s10, %s16_s10 }
   0x5   :  { %p142_p0 = scmp.ne.s32.totalorder %s16_s10, %s141_s11  ;;  %p147_p2 = scmp.lt.s32.totalorder %s141_s11, %s141_s11 }
   0x7   :  { %p148_p3 = por %p147_p2, %p146_p1 }
   0x9   :  { %p149_p4 = pnand %p148_p3, %p142_p0 }
   0xb   :  { %152 = shalt.err (!%p149_p4)
}
   0xc   :  { %s200_s12 = smov 128   ;;  %s201_s13 = smov 8  }
   0xd   :  { %21 = dma.hbm_to_vmem [thread:$0]  %s228_s0, 256, %s16_s10, [#allocation3], %s200_s12, %s200_s12, %s201_s13  }
   0xe   :  { %s202_s16 = smov [#allocation5]  }
   0xf   :  { %s27_s17 = sshll.u32 %s202_s16, 4  ;;  %s28_s17 = int_to_ptr.vmem [resolvable:$true] %s27_s17 }
  0x10   :  { %s161_s18 = scalar_lea.vmem %s28_s17, 256  ;;  %p166_p6 = scmp.lt.s32.totalorder %s28_s17, %s28_s17 }
  0x11   :  { %p162_p5 = scmp.ne.s32.totalorder %s28_s17, %s161_s18  ;;  %p167_p7 = scmp.lt.s32.totalorder %s161_s18, %s161_s18 }
  0x13   :  { %p168_p8 = por %p167_p7, %p166_p6 }
  0x15   :  { %p169_p9 = pnand %p168_p8, %p162_p5 }
  0x17   :  { %172 = shalt.err (!%p169_p9)
}
  0x18   :  { %33 = dma.hbm_to_vmem [thread:$0]  %s229_s1, 256, %s28_s17, [#allocation6], %s200_s12, %s200_s12, %s201_s13  }
  0x19   :  { %193 = dma.done.wait [#allocation3], 256  }
  0x1a   :  { %194 = vsyncadd [#allocation3], 4294967040 }
  0x1b   :  { %195 = dma.done.wait [#allocation6], 256  }
  0x1c   :  { %196 = vsyncadd [#allocation6], 4294967040  ;;  %v42_v0 = vld [vmem:[#allocation5] sm:$0xff]  ;;  %v43_v1 = vld [vmem:[#allocation5 + $0x8] sm:$0xff]  ;;  %s203_s0 = smov [#allocation7]  }
  0x1d   :  { %v58_v2 = vsub.f32 0.0, %v42_v0  ;;  %v40_v3 = vld [vmem:[#allocation2] sm:$0xff]  ;;  %v59_v4 = vsub.f32 0.0, %v43_v1  ;;  %v41_v5 = vld [vmem:[#allocation2 + $0x8] sm:$0xff]  ;;  %s98_s1 = sshll.u32 %s203_s0, 4  ;;  %s99_s1 = int_to_ptr.vmem [resolvable:$true] %s98_s1 }
  0x1e   :  { %v44_v8 = vsub.f32 0.0, %v40_v3  ;;  %v45_v9 = vsub.f32 0.0, %v41_v5  ;;  %s173_s21 = scalar_lea.vmem %s99_s1, 16  ;;  %s177_s22 = scalar_lea.vmem %s99_s1, 32 }
  0x1f   :  { %v60_v6 = vmul.f32 1.442695, %v58_v2  ;;  %v62_v7 = vmul.f32 1.442695, %v59_v4  ;;  %p174_p10 = scmp.ne.s32.totalorder %s99_s1, %s173_s21  ;;  %p178_p11 = scmp.lt.s32.totalorder %s99_s1, %s99_s1 }
  0x20   :  { %v46_v10 = vmul.f32 1.442695, %v44_v8  ;;  %v48_v11 = vmul.f32 1.442695, %v45_v9  ;;  %p179_p12 = scmp.lt.s32.totalorder %s177_s22, %s173_s21 }
  0x21   :  { %113 = vpow2.f32 %v60_v6 }
  0x22   :  { %115 = vpow2.f32 %v62_v7  ;;  %p180_p13 = por %p179_p12, %p178_p11 }
  0x23   :  { %117 = vpow2.f32 %v46_v10 }
  0x24   :  { %119 = vpow2.f32 %v48_v11  ;;  %p181_p0 = pnand %p180_p13, %p174_p10 }
  0x2e   :  { %v114_v12 = vpop.eup %113 }
  0x2f   :  { %v116_v13 = vpop.eup %115  ;;  %v64_v14 = vadd.f32 1.0, %v114_v12 }
  0x30   :  { %v65_v15 = vadd.f32 1.0, %v116_v13  ;;  %v118_v16 = vpop.eup %117 }
  0x31   :  { %121 = vrcp.f32 %v64_v14  ;;  %v120_v17 = vpop.eup %119  ;;  %v50_v18 = vadd.f32 1.0, %v118_v16 }
  0x32   :  { %123 = vrcp.f32 %v65_v15  ;;  %v51_v19 = vadd.f32 1.0, %v120_v17 }
  0x33   :  { %125 = vrcp.f32 %v50_v18 }
  0x34   :  { %127 = vrcp.f32 %v51_v19 }
  0x3e   :  { %v122_v20 = vpop.eup %121 }
  0x3f   :  { %v124_v21 = vpop.eup %123  ;;  %v70_v22 = vmul.f32 0.25, %v122_v20 }
  0x40   :  { %v71_v23 = vmul.f32 0.25, %v124_v21  ;;  %v126_v24 = vpop.eup %125 }
  0x41   :  { %129 = vrcp.f32 %v70_v22  ;;  %v128_v25 = vpop.eup %127  ;;  %v56_v26 = vmul.f32 0.25, %v126_v24  ;;  %v72_v27 = vsub.f32 1.0, %v70_v22 }
  0x42   :  { %131 = vrcp.f32 %v71_v23  ;;  %v57_v28 = vmul.f32 0.25, %v128_v25  ;;  %v73_v29 = vsub.f32 1.0, %v71_v23 }
  0x43   :  { %v74_v32 = vmul.f32 %v72_v27, %v72_v27 }
  0x44   :  { %v75_v34 = vmul.f32 %v73_v29, %v73_v29 }
  0x4e   :  { %v130_v30 = vpop.eup %129 }
  0x4f   :  { %v132_v31 = vpop.eup %131  ;;  %v77_v33 = vmul.f32 %v130_v30, %v56_v26 }
  0x50   :  { %v79_v35 = vmul.f32 %v132_v31, %v57_v28 }
  0x51   :  { %v80_v36 = vmul.f32 %v77_v33, %v56_v26 }
  0x52   :  { %v81_v37 = vmul.f32 %v79_v35, %v57_v28 }
  0x53   :  { %v82_v38 = vmul.f32 %v80_v36, %v74_v32 }
  0x54   :  { %v83_v39 = vmul.f32 %v81_v37, %v75_v34 }
  0x56   :  { %v84_v40 = vadd.f32 %v83_v39, %v82_v38 }
  0x58   :  { %v85_v41 = vrot.slane %v84_v40, 4 }
  0x5a   :  { %v86_v42 = vadd.f32 %v85_v41, %v84_v40 }
  0x5c   :  { %v87_v43 = vrot.slane %v86_v42, 2 }
  0x5e   :  { %v88_v44 = vadd.f32 %v87_v43, %v86_v42 }
  0x60   :  { %v89_v45 = vrot.slane %v88_v44, 1 }
  0x62   :  { %v90_v46 = vadd.f32 %v89_v45, %v88_v44 }
  0x64   :  { %91 = vst [vmem:[#allocation7] sm:$0x1] %v90_v46 }
  0x65   :  { %184 = shalt.err (!%p181_p0)
}
  0x66   :  { %101 = dma.vmem_to_hbm [thread:$0]  %s99_s1, 16, %s230_s2, [#allocation4]  }
  0x67   :  { %197 = dma.done.wait [#allocation4], 16  }
  0x68   :  { %198 = vsyncadd [#allocation4], 4294967280 }
  0x69   :  { %105 = vsyncpa [#allocation3], 1 }
  0x6a   :  { %106 = vsyncpa [#allocation6], 1 }
  0x6b   :  { %107 = vsyncpa [#allocation4], 1 }

</bundles_post_ra>
